<compile_context>
chip_gen: v5e
topology: v5e:2x2
jax: 0.10.0
libtpu: 0.0.40
codegen_flags: <defaults>
</compile_context>

<pallas_src>
import jax
import jax.numpy as jnp
from jax.experimental import pallas as pl
from jax.experimental.pallas import tpu as pltpu


def actor_kernel(obs_ref, misc_ref, w1_ref, w2_ref, w3_ref, out_ref):
    F = obs_ref.shape[-1]
    H = w1_ref.shape[-1]
    AP = out_ref.shape[-1]                               # 128-padded action lanes

    x = obs_ref[...].astype(jnp.float32)                 # [TB, F]; obs may arrive bf16

    misc = misc_ref[...]                                 # [5, P] f32 packed small params
    gamma = misc[0:1, :F]
    beta = misc[1:2, :F]
    b1 = misc[2:3, :H]
    b2 = misc[3:4, :H]
    b3 = misc[4:5, :AP]

    # --- trunk: LayerNorm(feature_dim) (biased var, eps=1e-5) + Tanh, in f32 ---
    mean = jnp.mean(x, axis=-1, keepdims=True)
    var = jnp.mean(jnp.square(x - mean), axis=-1, keepdims=True)
    xhat = (x - mean) * jax.lax.rsqrt(var + 1e-5)
    h = jnp.tanh(xhat * gamma + beta)

    # --- policy MLP: bf16 MXU matmuls with f32 accumulation; elementwise kept f32
    #     (v5e VPU/EUP have no bf16; on v6e/v7x the extra f32 VPU work hides under MXU). ---
    h = jnp.dot(h.astype(jnp.bfloat16), w1_ref[...],
                preferred_element_type=jnp.float32) + b1
    h = jnp.maximum(h, 0.0)
    h = jnp.dot(h.astype(jnp.bfloat16), w2_ref[...],
                preferred_element_type=jnp.float32) + b2
    h = jnp.maximum(h, 0.0)
    mu = jnp.dot(h.astype(jnp.bfloat16), w3_ref[...],
                 preferred_element_type=jnp.float32) + b3

    # Lane-dense (128-wide) bf16 store; padded lanes/rows are sliced off in the wrapper.
    out_ref[...] = jnp.tanh(mu).astype(out_ref.dtype)


def _choose_tile_b(B):
    """Largest tile in {512,...,8} that still yields >=2 grid steps (>=4 when B is large),
    so megacore sharding (v7x) and DMA/compute overlap actually kick in."""
    min_steps = 4 if B >= 1024 else 2
    for t in (512, 256, 128, 64, 32, 16, 8):
        if pl.cdiv(B, t) >= min_steps:
            return t
    return 8                                             # B <= 8: single step is unavoidable


def actor_forward(obs, params, tile_b=None, obs_dtype=None):
    """obs: [B, F] float32. params: dict from make_params().
    obs_dtype=jnp.bfloat16 optionally halves the obs HBM read (LN still computed in f32)."""
    B, F = obs.shape
    action_dim = params["action_dim"]
    a_pad = params["w3p"].shape[1]                       # 128-padded action lanes

    if obs_dtype is not None:
        obs = obs.astype(obs_dtype)

    tile_b = tile_b if tile_b is not None else _choose_tile_b(B)
    Bp = pl.cdiv(B, tile_b) * tile_b
    if Bp != B:
        # Zero-padded rows are safe through LayerNorm: mean=0, var=0 -> xhat = 0*rsqrt(eps)=0
        # (no NaN); padded rows are sliced off below regardless.
        obs = jnp.pad(obs, ((0, Bp - B), (0, 0)))

    # Constant index map -> block stays VMEM-resident across all grid steps.
    resident = lambda a: pl.BlockSpec(a.shape, lambda i: (0,) * a.ndim,
                                      memory_space=pltpu.VMEM)

    out = pl.pallas_call(
        actor_kernel,
        out_shape=jax.ShapeDtypeStruct((Bp, a_pad), jnp.bfloat16),
        grid=(Bp // tile_b,),
        in_specs=[
            pl.BlockSpec((tile_b, F), lambda i: (i, 0), memory_space=pltpu.VMEM),
            resident(params["misc"]),                    # (5, P)   f32  [gamma,beta,b1,b2,b3]
            resident(params["w1"]),                      # (F, H)   bf16
            resident(params["w2"]),                      # (H, H)   bf16
            resident(params["w3p"]),                     # (H, 128) bf16
        ],
        out_specs=pl.BlockSpec((tile_b, a_pad), lambda i: (i, 0),
                               memory_space=pltpu.VMEM),
        compiler_params=pltpu.CompilerParams(
            dimension_semantics=("parallel",)),
    )(obs, params["misc"], params["w1"], params["w2"], params["w3p"])

    return out[:B, :action_dim]


def make_params(key, feature_dim, hidden_dim, action_dim, a_pad=128):
    """Deterministic synthetic init (stand-in for utils.network_init).
    Keep hidden_dim a multiple of 256 on v6e/v7x (128 on v5e) for full MXU contraction depth."""
    ks = jax.random.split(key, 8)
    scale = lambda fan_in: 1.0 / jnp.sqrt(jnp.float32(fan_in))

    w1 = jax.random.normal(ks[0], (feature_dim, hidden_dim), jnp.float32) * scale(feature_dim)
    w2 = jax.random.normal(ks[1], (hidden_dim, hidden_dim), jnp.float32) * scale(hidden_dim)
    w3 = jax.random.normal(ks[2], (hidden_dim, action_dim), jnp.float32) * scale(hidden_dim)
    # Pad W3 out to 128 lanes (exactly 128 — no more) so the output store is lane-dense.
    w3p = jnp.zeros((hidden_dim, a_pad), jnp.float32).at[:, :action_dim].set(w3)

    # Pack every small parameter into ONE resident array (single tiny DMA per call):
    #   row 0: LN gamma (first F lanes), row 1: LN beta (first F lanes),
    #   row 2: b1 (first H lanes),       row 3: b2 (first H lanes),
    #   row 4: b3 (first 128 lanes, only action_dim live).
    P = ((max(feature_dim, hidden_dim, a_pad) + 127) // 128) * 128
    misc = jnp.zeros((5, P), jnp.float32)
    misc = misc.at[0, :feature_dim].set(1.0 + 0.1 * jax.random.normal(ks[3], (feature_dim,)))
    misc = misc.at[1, :feature_dim].set(0.1 * jax.random.normal(ks[4], (feature_dim,)))
    misc = misc.at[2, :hidden_dim].set(0.1 * jax.random.normal(ks[5], (hidden_dim,)))
    misc = misc.at[3, :hidden_dim].set(0.1 * jax.random.normal(ks[6], (hidden_dim,)))
    misc = misc.at[4, :action_dim].set(0.1 * jax.random.normal(ks[7], (action_dim,)))

    return {
        "action_dim": action_dim,
        "misc": misc,
        # Linear weights stored as [in, out], bf16 in HBM (MXU-native).
        "w1": w1.astype(jnp.bfloat16),
        "w2": w2.astype(jnp.bfloat16),
        "w3p": w3p.astype(jnp.bfloat16),
    }


def actor_ref(obs, p):
    """Pure-JAX reference with the same bf16-matmul / f32-accum / bf16-output semantics.
    NOTE: deviates from a pure-f32 torch Actor at ~1e-2 relative in mu (fine for RL)."""
    misc = p["misc"]
    F = obs.shape[-1]
    H = p["w1"].shape[-1]
    AP = p["w3p"].shape[-1]
    gamma, beta = misc[0:1, :F], misc[1:2, :F]
    b1, b2, b3 = misc[2:3, :H], misc[3:4, :H], misc[4:5, :AP]
    mean = jnp.mean(obs, axis=-1, keepdims=True)
    var = jnp.mean(jnp.square(obs - mean), axis=-1, keepdims=True)
    h = jnp.tanh((obs - mean) * jax.lax.rsqrt(var + 1e-5) * gamma + beta)
    h = jax.nn.relu(jnp.dot(h.astype(jnp.bfloat16), p["w1"],
                            preferred_element_type=jnp.float32) + b1)
    h = jax.nn.relu(jnp.dot(h.astype(jnp.bfloat16), p["w2"],
                            preferred_element_type=jnp.float32) + b2)
    mu = jnp.dot(h.astype(jnp.bfloat16), p["w3p"],
                 preferred_element_type=jnp.float32) + b3
    return jnp.tanh(mu).astype(jnp.bfloat16)[:, :p["action_dim"]]


if __name__ == "__main__":
    # B=64 -> tile_b=32 -> 2 grid steps: exercises the pipelined/multi-step path and gives
    # the "parallel" batch axis something to shard across v7x's two TensorCores.
    B, feature_dim, hidden_dim, action_dim = 64, 64, 256, 6

    key = jax.random.PRNGKey(0)
    k_obs, k_par = jax.random.split(key)
    obs = jax.random.normal(k_obs, (B, feature_dim), jnp.float32)
    params = make_params(k_par, feature_dim, hidden_dim, action_dim)

    assert _choose_tile_b(B) == 32 and (B // 32) == 2    # multi-step grid really exercised

    mu = actor_forward(obs, params)
    mu = jax.block_until_ready(mu)

    ref = actor_ref(obs, params)
    assert mu.shape == (B, action_dim)
    assert mu.dtype == jnp.bfloat16
    err = jnp.max(jnp.abs(mu.astype(jnp.float32) - ref.astype(jnp.float32)))
    assert err < 2e-2, f"mismatch vs reference: max err {err}"

    print("KERNEL_OK")
</pallas_src>

<mosaic_0001>
module attributes {stable_mosaic.version = 11 : i64} {
  func.func @actor_kernel(%arg0: i32, %arg1: memref<32x64xf32, #tpu.memory_space<vmem>>, %arg2: memref<5x256xf32, #tpu.memory_space<vmem>>, %arg3: memref<64x256xbf16, #tpu.memory_space<vmem>>, %arg4: memref<256x256xbf16, #tpu.memory_space<vmem>>, %arg5: memref<256x128xbf16, #tpu.memory_space<vmem>>, %arg6: memref<32x128xbf16, #tpu.memory_space<vmem>>) attributes {dimension_semantics = [#tpu.dimension_semantics<parallel>], iteration_bounds = array<i64: 2>, scalar_prefetch = 0 : i64, scratch_operands = 0 : i64, tpu.core_type = #tpu.core_type<tc>, window_params = [{transform_indices = @transform_0, window_bounds = array<i64: 32, 64>}, {pipeline_mode = #tpu.pipeline_mode<synchronous>, transform_indices = @transform_1, window_bounds = array<i64: 5, 256>}, {pipeline_mode = #tpu.pipeline_mode<synchronous>, transform_indices = @transform_2, window_bounds = array<i64: 64, 256>}, {pipeline_mode = #tpu.pipeline_mode<synchronous>, transform_indices = @transform_3, window_bounds = array<i64: 256, 256>}, {pipeline_mode = #tpu.pipeline_mode<synchronous>, transform_indices = @transform_4, window_bounds = array<i64: 256, 128>}, {transform_indices = @transform_5, window_bounds = array<i64: 32, 128>}]} {
    %c0 = arith.constant 0 : index
    %c0_0 = arith.constant 0 : index
    %0 = vector.load %arg1[%c0, %c0_0] : memref<32x64xf32, #tpu.memory_space<vmem>>, vector<32x64xf32>
    %c0_1 = arith.constant 0 : index
    %c0_2 = arith.constant 0 : index
    %1 = vector.load %arg2[%c0_1, %c0_2] : memref<5x256xf32, #tpu.memory_space<vmem>>, vector<5x256xf32>
    %2 = vector.extract_strided_slice %1 {offsets = [0, 0], sizes = [1, 64], strides = [1, 1]} : vector<5x256xf32> to vector<1x64xf32>
    %3 = vector.extract_strided_slice %1 {offsets = [1, 0], sizes = [1, 64], strides = [1, 1]} : vector<5x256xf32> to vector<1x64xf32>
    %4 = vector.extract_strided_slice %1 {offsets = [2, 0], sizes = [1, 256], strides = [1, 1]} : vector<5x256xf32> to vector<1x256xf32>
    %5 = vector.extract_strided_slice %1 {offsets = [3, 0], sizes = [1, 256], strides = [1, 1]} : vector<5x256xf32> to vector<1x256xf32>
    %6 = vector.extract_strided_slice %1 {offsets = [4, 0], sizes = [1, 128], strides = [1, 1]} : vector<5x256xf32> to vector<1x128xf32>
    %cst = arith.constant dense<0.000000e+00> : vector<32xf32>
    %7 = vector.multi_reduction <add>, %0, %cst [1] : vector<32x64xf32> to vector<32xf32>
    %8 = vector.shape_cast %7 : vector<32xf32> to vector<32x1xf32>
    %cst_3 = arith.constant 6.400000e+01 : f32
    %9 = vector.broadcast %cst_3 : f32 to vector<32x1xf32>
    %10 = arith.divf %8, %9 : vector<32x1xf32>
    %11 = vector.broadcast %10 : vector<32x1xf32> to vector<32x64xf32>
    %12 = arith.subf %0, %11 : vector<32x64xf32>
    %13 = arith.mulf %12, %12 : vector<32x64xf32>
    %cst_4 = arith.constant dense<0.000000e+00> : vector<32xf32>
    %14 = vector.multi_reduction <add>, %13, %cst_4 [1] : vector<32x64xf32> to vector<32xf32>
    %15 = vector.shape_cast %14 : vector<32xf32> to vector<32x1xf32>
    %cst_5 = arith.constant 6.400000e+01 : f32
    %16 = vector.broadcast %cst_5 : f32 to vector<32x1xf32>
    %17 = arith.divf %15, %16 : vector<32x1xf32>
    %18 = vector.broadcast %10 : vector<32x1xf32> to vector<32x64xf32>
    %19 = arith.subf %0, %18 : vector<32x64xf32>
    %cst_6 = arith.constant 9.99999974E-6 : f32
    %20 = vector.broadcast %cst_6 : f32 to vector<32x1xf32>
    %21 = arith.addf %17, %20 : vector<32x1xf32>
    %22 = math.rsqrt %21 : vector<32x1xf32>
    %23 = vector.broadcast %22 : vector<32x1xf32> to vector<32x64xf32>
    %24 = arith.mulf %19, %23 : vector<32x64xf32>
    %25 = vector.broadcast %2 : vector<1x64xf32> to vector<32x64xf32>
    %26 = arith.mulf %24, %25 : vector<32x64xf32>
    %27 = vector.broadcast %3 : vector<1x64xf32> to vector<32x64xf32>
    %28 = arith.addf %26, %27 : vector<32x64xf32>
    %29 = math.tanh %28 : vector<32x64xf32>
    %30 = arith.truncf %29 : vector<32x64xf32> to vector<32x64xbf16>
    %c0_7 = arith.constant 0 : index
    %c0_8 = arith.constant 0 : index
    %31 = vector.load %arg3[%c0_7, %c0_8] : memref<64x256xbf16, #tpu.memory_space<vmem>>, vector<64x256xbf16>
    %cst_9 = arith.constant dense<0.000000e+00> : vector<32x256xf32>
    %32 = tpu.matmul %30, %31, %cst_9 {dimension_numbers = #tpu.dot_dimension_numbers<[1], [0], [0], [1], [0, 0, 1, 1], [], []>} : vector<32x64xbf16>, vector<64x256xbf16>, vector<32x256xf32> -> vector<32x256xf32>
    %33 = vector.broadcast %4 : vector<1x256xf32> to vector<32x256xf32>
    %34 = arith.addf %32, %33 : vector<32x256xf32>
    %cst_10 = arith.constant 0.000000e+00 : f32
    %35 = vector.broadcast %cst_10 : f32 to vector<32x256xf32>
    %36 = arith.maximumf %34, %35 : vector<32x256xf32>
    %37 = arith.truncf %36 : vector<32x256xf32> to vector<32x256xbf16>
    %c0_11 = arith.constant 0 : index
    %c0_12 = arith.constant 0 : index
    %38 = vector.load %arg4[%c0_11, %c0_12] : memref<256x256xbf16, #tpu.memory_space<vmem>>, vector<256x256xbf16>
    %cst_13 = arith.constant dense<0.000000e+00> : vector<32x256xf32>
    %39 = tpu.matmul %37, %38, %cst_13 {dimension_numbers = #tpu.dot_dimension_numbers<[1], [0], [0], [1], [0, 0, 1, 1], [], []>} : vector<32x256xbf16>, vector<256x256xbf16>, vector<32x256xf32> -> vector<32x256xf32>
    %40 = vector.broadcast %5 : vector<1x256xf32> to vector<32x256xf32>
    %41 = arith.addf %39, %40 : vector<32x256xf32>
    %cst_14 = arith.constant 0.000000e+00 : f32
    %42 = vector.broadcast %cst_14 : f32 to vector<32x256xf32>
    %43 = arith.maximumf %41, %42 : vector<32x256xf32>
    %44 = arith.truncf %43 : vector<32x256xf32> to vector<32x256xbf16>
    %c0_15 = arith.constant 0 : index
    %c0_16 = arith.constant 0 : index
    %45 = vector.load %arg5[%c0_15, %c0_16] : memref<256x128xbf16, #tpu.memory_space<vmem>>, vector<256x128xbf16>
    %cst_17 = arith.constant dense<0.000000e+00> : vector<32x128xf32>
    %46 = tpu.matmul %44, %45, %cst_17 {dimension_numbers = #tpu.dot_dimension_numbers<[1], [0], [0], [1], [0, 0, 1, 1], [], []>} : vector<32x256xbf16>, vector<256x128xbf16>, vector<32x128xf32> -> vector<32x128xf32>
    %47 = vector.broadcast %6 : vector<1x128xf32> to vector<32x128xf32>
    %48 = arith.addf %46, %47 : vector<32x128xf32>
    %49 = math.tanh %48 : vector<32x128xf32>
    %50 = arith.truncf %49 : vector<32x128xf32> to vector<32x128xbf16>
    %c0_18 = arith.constant 0 : index
    %c0_19 = arith.constant 0 : index
    %51 = vector.load %arg6[%c0_18, %c0_19] : memref<32x128xbf16, #tpu.memory_space<vmem>>, vector<32x128xbf16>
    tpu.vector_store %arg6[%c0_18, %c0_19], %50 {strides = array<i32>} : memref<32x128xbf16, #tpu.memory_space<vmem>>, vector<32x128xbf16>,
    return
  }
  func.func @transform_0(%arg0: i32) -> (i32, i32) {
    %c0_i32 = arith.constant 0 : i32
    %c0_i32_0 = arith.constant 0 : i32
    return %arg0, %c0_i32 : i32, i32
  }
  func.func @transform_1(%arg0: i32) -> (i32, i32) {
    %c0_i32 = arith.constant 0 : i32
    %c0_i32_0 = arith.constant 0 : i32
    %c0_i32_1 = arith.constant 0 : i32
    return %c0_i32, %c0_i32_0 : i32, i32
  }
  func.func @transform_2(%arg0: i32) -> (i32, i32) {
    %c0_i32 = arith.constant 0 : i32
    %c0_i32_0 = arith.constant 0 : i32
    %c0_i32_1 = arith.constant 0 : i32
    return %c0_i32, %c0_i32_0 : i32, i32
  }
  func.func @transform_3(%arg0: i32) -> (i32, i32) {
    %c0_i32 = arith.constant 0 : i32
    %c0_i32_0 = arith.constant 0 : i32
    %c0_i32_1 = arith.constant 0 : i32
    return %c0_i32, %c0_i32_0 : i32, i32
  }
  func.func @transform_4(%arg0: i32) -> (i32, i32) {
    %c0_i32 = arith.constant 0 : i32
    %c0_i32_0 = arith.constant 0 : i32
    %c0_i32_1 = arith.constant 0 : i32
    return %c0_i32, %c0_i32_0 : i32, i32
  }
  func.func @transform_5(%arg0: i32) -> (i32, i32) {
    %c0_i32 = arith.constant 0 : i32
    %c0_i32_0 = arith.constant 0 : i32
    return %arg0, %c0_i32 : i32, i32
  }
}

</mosaic_0001>

<bundles_post_ra>
// kernel: tpu_custom_call.1
= control target key start
LH: loop header
LB: loop body
LE: loop exit
PB: predicated region body
PF: predicated region fallthrough
CT: control target
= control target key end

     0   :  { %10 = vsyncpa [#allocation3], 0  ;;  %s2094_s0 = inlined_call_operand.hbm [shape: f32[64,64], index: 0, kind: input, shape index: {}]   ;;  %s2095_s1 = inlined_call_operand.hbm [shape: f32[5,256], index: 1, kind: input, shape index: {}]   ;;  %s2096_s2 = inlined_call_operand.hbm [shape: bf16[64,256], index: 2, kind: input, shape index: {}]   ;;  %s2097_s3 = inlined_call_operand.hbm [shape: bf16[256,256], index: 3, kind: input, shape index: {}]   ;;  %s2098_s4 = inlined_call_operand.hbm [shape: bf16[256,128], index: 4, kind: input, shape index: {}]   ;;  %s2099_s5 = inlined_call_operand.hbm [shape: bf16[64,128], index: 5, kind: output, shape index: {}]  }
   0x1   :  { %12 = vsyncpa [#allocation3 + $0x1], 0 }
   0x2   :  { %13 = vsyncpa [#allocation6], 0 }
   0x3   :  { %14 = vsyncpa [#allocation9], 0 }
   0x4   :  { %15 = vsyncpa [#allocation4], 0 }
   0x5   :  { %17 = vsyncpa [#allocation4 + $0x1], 0  ;;  %s1830_s18 = smov 0   ;;  %s1832_s19 = smov 0  }
   0x6   :  { %s1834_s20 = smov 0   ;;  %s1836_s21 = smov 0  }
   0x7 LB: > { %s1851_s22 = sadd.s32 4294967295, %s1787_s21   ;;  %s1124_s23 = sadd.s32 4294967294, %s1787_s21   ;;  %s1787_s21 = sphi %s1836_s21, %s2116_s21   ;;  %s1783_s20 = sphi %s1834_s20, %s2115_s20   ;;  %s1779_s19 = sphi %s1832_s19, %s2114_s19   ;;  %s1775_s18 = sphi %s1830_s18, %s2113_s18  }
   0x8   : > { %p43_p0 = scmp.ne.s32.totalorder %s1779_s19, %s1775_s18  ;;  %p44_p1 = scmp.eq.s32.totalorder %s1851_s22, 0 }
   0x9   : > { %p151_p2 = scmp.eq.s32.totalorder %s1851_s22, 1  ;;  %p157_p3 = scmp.eq.s32.totalorder %s1124_s23, 1 }
   0xa   : > { %p1860_p4 = por %p44_p1, %p43_p0  ;;  %p1125_p5 = scmp.ge.s32.totalorder %s1787_s21, 1 }
   0xb   : > { %p1865_p6 = por %p157_p3, %p43_p0  ;;  %p164_p7 = scmp.lt.s32.totalorder %s1787_s21, 3 }
   0xc   : > { %s176_s28 = sshll.u32 %s2095_s1, 4  ;;  %s1789_s30 = smov [#allocation5]   ;;  %s177_s28 = int_to_ptr.hbm [resolvable:$true] %s176_s28 }
   0xd   : > { %p1873_p8 = pnand %p1125_p5, %p164_p7  ;;  %s178_s6 = sshll.u32 %s1789_s30, 4  ;;  %s179_s6 = int_to_ptr.vmem [resolvable:$true] %s178_s6 }
   0xe   : > { %s201_s10 = sshll.u32 %s2097_s3, 4  ;;  %s1790_s11 = smov [#allocation8]   ;;  %s202_s10 = int_to_ptr.hbm [resolvable:$true] %s201_s10 }
   0xf   : > { %p1463_p10 = pneg %p1873_p8  ;;  %s203_s12 = sshll.u32 %s1790_s11, 4  ;;  %s204_s12 = int_to_ptr.vmem [resolvable:$true] %s203_s12 }
  0x10   : > { %s187_s15 = sshll.u32 %s2096_s2, 4  ;;  %s2100_s16 = smov 128   ;;  %s188_s15 = int_to_ptr.hbm [resolvable:$true] %s187_s15 }
  0x11   : > { %p1882_p11 = pnand %p1463_p10, %p44_p1  ;;  %s1792_s17 = smov 8  }
  0x12   : > { %s215_s27 = sshll.u32 %s2098_s4, 4  ;;  %s1795_s9 = smov 64   ;;  %s216_s27 = int_to_ptr.hbm [resolvable:$true] %s215_s27 }
  0x13   : > { %1466 = dma.hbm_to_vmem [thread:$0]  (!%p1882_p11), %s177_s28, 256, %s179_s6, [#allocation6]  }
  0x14   : > { %1472 = dma.hbm_to_vmem [thread:$0]  (!%p1882_p11), %s202_s10, 4096, %s204_s12, [#allocation9], %s2100_s16, %s2100_s16, %s1792_s17  }
  0x15   : > { %s1793_s28 = smov [#allocation7]   ;;  %s1794_s6 = smov [#allocation10]  }
  0x16   : > { %s189_s30 = sshll.u32 %s1793_s28, 4  ;;  %s217_s8 = sshll.u32 %s1794_s6, 4  ;;  %s190_s30 = int_to_ptr.vmem [resolvable:$true] %s189_s30  ;;  %s218_s8 = int_to_ptr.vmem [resolvable:$true] %s217_s8 }
  0x17   : > { %1469 = dma.hbm_to_vmem [thread:$0]  (!%p1882_p11), %s188_s15, 1024, %s190_s30, [#allocation6], %s2100_s16, %s2100_s16, %s1792_s17  }
  0x18   : > { %s1796_s10 = smov 4   ;;  %s1910_s11 = sadd.s32 1, %s1787_s21  }
  0x19   : > { %1475 = dma.hbm_to_vmem [thread:$0]  (!%p1882_p11), %s216_s27, 2048, %s218_s8, [#allocation9], %s1795_s9, %s1795_s9, %s1796_s10  }
  0x1a   : > { %s27_s12 = ssub.s32 %s1787_s21, %s1910_s11  ;;  %s30_s13 = sadd.s32 1, %s1783_s20 }
  0x1b   : > { %p28_p12 = scmp.eq.s32.totalorder %s27_s12, 0  ;;  %p37_p13 = scmp.ne.s32.totalorder %s1783_s20, %s1779_s19 }
  0x1c   : > { %p38_p0 = scmp.eq.s32.totalorder %s1787_s21, 0  ;;  %p1488_p7 = scmp.lt.s32.totalorder %s1787_s21, 2 }
  0x1d   : > { %s1919_s14 = scalar_select %p28_p12, %s1783_s20, %s30_s13  }
  0x1e   : > { %p39_p3 = por %p38_p0, %p37_p13  ;;  %p1923_p5 = por %p151_p2, %p37_p13 }
  0x1f   : > { %s231_s23 = sand.u32 1, %s1783_s20   ;;  %s1374_s26 = sshll.u32 %s1787_s21, 5 }
  0x20   : > { %s1131_s7 = sshll.u32 %s231_s23, 5  ;;  %s240_s30 = scalar_lea.hbm %s2094_s0, %s1374_s26 }
  0x21   : > { %s235_s6 = scalar_lea.vmem [#allocation2], %s1131_s7  ;;  %s241_s9 = sshll.u32 %s240_s30, 4  ;;  %s242_s9 = int_to_ptr.hbm [resolvable:$true] %s241_s9 }
  0x22   : > { %s243_s8 = sshll.u32 %s235_s6, 4  ;;  %p1933_p10 = pnand %p1488_p7, %p39_p3  ;;  %s244_s8 = int_to_ptr.vmem [resolvable:$true] %s243_s8 }
  0x23   : > { %s232_s12 = scalar_lea.sflag [#allocation3], %s231_s23  ;;  %s1683_s13 = sshra.s32 %s242_s9, 4  ;;  %s1684_s13 = int_to_ptr.hbm [resolvable:$true] %s1683_s13 }
  0x24   : > { %s1685_s16 = scalar_lea.hbm %s1684_s13, 32  ;;  %p1687_p11 = pneg %p1933_p10 }
  0x25   : > { %p1686_p2 = scmp.ne.s32.totalorder %s1684_s13, %s1685_s16  ;;  %s1690_s27 = scalar_lea.hbm %s2094_s0, 64 }
  0x26   : > { %p1691_p0 = scmp.lt.s32.totalorder %s1684_s13, %s2094_s0  ;;  %p1692_p3 = scmp.lt.s32.totalorder %s1690_s27, %s1685_s16 }
  0x27   : > { %p1688_p12 = pnand %p1687_p11, %p1686_p2 }
  0x28   : > { %p1693_p7 = por %p1692_p3, %p1691_p0 }
  0x29   : > { %p1689_p13 = pneg %p1688_p12 }
  0x2b   : > { %p1694_p9 = pnand %p1693_p7, %p1689_p13 }
  0x2d   : > { %1697 = shalt.err (!%p1694_p9)
}
  0x2e   : > { %s2107_s23 = smov 128   ;;  %255 = sbr.rel (%p1873_p8) target bundleno = 804 (0x324), region = 40 }
  0x2f   : > { %1479 = dma.hbm_to_vmem [thread:$0]  (!%p1933_p10), %s242_s9, 512, %s244_s8, %s232_s12, %s2107_s23, %s2107_s23, %s1792_s17  }
  0x30   : > { %s1953_s6 = sand.u32 (!%p1873_p8), 1, %s1779_s19  }
  0x31   : > { %s1135_s13 = sshll.u32 (!%p1873_p8), %s1953_s6, 5  ;;  %s258_s16 = scalar_lea.sflag (!%p1873_p8), [#allocation3], %s1953_s6 }
  0x32   : > { %s261_s26 = scalar_lea.vmem (!%p1873_p8), [#allocation2], %s1135_s13 }
  0x33   : > { %1758 = dma.done.wait (%p1860_p4), %s258_s16, 512  }
  0x34   : > { %1760 = vsyncadd (%p1860_p4), %s258_s16, 4294966784 }
  0x35   : > { %1762 = dma.done.wait (%p44_p1), [#allocation6], 1280  }
  0x36   : > { %1764 = vsyncadd (%p44_p1), [#allocation6], 4294966016 }
  0x37   : > { %1766 = dma.done.wait (%p44_p1), [#allocation9], 6144  }
  0x38   : > { %1768 = vsyncadd (%p44_p1), [#allocation9], 4294961152  ;;  %vm318_vm0 = vcmask 523264   ;;  %v314_v0 = vld [vmem:[%s261_s26 + $0x10] sm:$0xff]  ;;  %v312_v1 = vld [vmem:[%s261_s26] sm:$0xff]  ;;  %v1797_v8 = vmov 64.0  }
  0x39   : > { %v325_v2 = vsel %vm318_vm0, %v314_v0, 0.0  ;;  %v319_v3 = vsel %vm318_vm0, %v312_v1, 0.0  ;;  %v315_v4 = vld [vmem:[%s261_s26 + $0x18] sm:$0xff]  ;;  %v313_v5 = vld [vmem:[%s261_s26 + $0x8] sm:$0xff]  ;;  %1537 = vrcp.f32 %v1797_v8  ;;  %v1167_v35 = vld [vmem:[#allocation7 + $0x30] sm:$0xf] }
  0x3a   : > { %326 = vadd.xlane.f32.xlu1 %v325_v2  ;;  %320 = vadd.xlane.f32.xlu0 %v319_v3  ;;  %v328_v6 = vsel %vm318_vm0, %v315_v4, 0.0  ;;  %v322_v7 = vsel %vm318_vm0, %v313_v5, 0.0  ;;  %v1382_v36 = vld [vmem:[#allocation7 + $0x34] sm:$0xf0]  ;;  %v1381_v37 = vld [vmem:[#allocation7 + $0x34] sm:$0xf] }
  0x3b   : > { %v1168_v38 = vor.u32 %v1382_v36, %v1167_v35  ;;  %v1169_v39 = vld [vmem:[#allocation7 + $0x38] sm:$0xf0]  ;;  %v1159_v45 = vld [vmem:[#allocation7 + $0x20] sm:$0xf]  ;;  %v1380_v46 = vld [vmem:[#allocation7 + $0x24] sm:$0xf0] }
  0x3c   : > { %v1172_v40 = vor.u32 %v1381_v37, %v1169_v39  ;;  %v1379_v47 = vld [vmem:[#allocation7 + $0x24] sm:$0xf]  ;;  %v1160_v48 = vor.u32 %v1380_v46, %v1159_v45  ;;  %v1161_v49 = vld [vmem:[#allocation7 + $0x28] sm:$0xf0]  ;;  %v1151_v50 = vld [vmem:[#allocation7 + $0x10] sm:$0xf] }
  0x3d   : > { %490 = vmatpush.bf16.msra.mxu0 %v1168_v38  ;;  %v1378_v51 = vld [vmem:[#allocation7 + $0x14] sm:$0xf0]  ;;  %v1164_v53 = vor.u32 %v1379_v47, %v1161_v49  ;;  %v1377_v54 = vld [vmem:[#allocation7 + $0x14] sm:$0xf]  ;;  %v1153_v56 = vld [vmem:[#allocation7 + $0x18] sm:$0xf0] }
  0x3e   : > { %509 = vmatpush.bf16.msra.mxu1 %v1172_v40  ;;  %v1152_v55 = vor.u32 %v1378_v51, %v1151_v50  ;;  %v1156_v58 = vor.u32 %v1377_v54, %v1153_v56  ;;  %v1143_v59 = vld [vmem:[#allocation7] sm:$0xf]  ;;  %v1376_v60 = vld [vmem:[#allocation7 + $0x4] sm:$0xf0]  ;;  %v1375_v61 = vld [vmem:[#allocation7 + $0x4] sm:$0xf] }
  0x3f   : > { %v1538_v9 = vpop.eup %1537  ;;  %v1145_v62 = vld [vmem:[#allocation7 + $0x8] sm:$0xf0]  ;;  %v1414_v46 = vld [vmem:[#allocation8 + $0xf4] sm:$0xf0]  ;;  %v1397_v47 = vld [vmem:[#allocation8 + $0x74] sm:$0xf] }
  0x40   : > { %v332_v10 = vmul.f32 64.0, %v1538_v9  ;;  %vm336_vm1 = vweird.f32 %v1538_v9  ;;  %v1301_v54 = vld [vmem:[#allocation8 + $0xf8] sm:$0xf0]  ;;  %s1140_s24 = sshll.u32 %s1953_s6, 4  ;;  %s1431_s17 = sshll.u32 %s1851_s22, 4 }
  0x41   : > { %491 = vmatpush.bf16.msra.mxu0 %v1160_v48  ;;  %v1237_v48 = vld [vmem:[#allocation8 + $0x78] sm:$0xf0]  ;;  %s308_s29 = scalar_lea.vmem [#allocation11], %s1140_s24  ;;  %s1009_s10 = scalar_lea.hbm %s2099_s5, %s1431_s17 }
  0x42   : > { %329 = vadd.xlane.f32.xlu1 %v328_v6  ;;  %323 = vadd.xlane.f32.xlu0 %v322_v7  ;;  %v333_v11 = vsub.f32 1.0, %v332_v10  ;;  %s1010_s12 = sshll.u32 %s308_s29, 4  ;;  %s1012_s7 = sshll.u32 %s1009_s10, 4  ;;  %s1011_s12 = int_to_ptr.vmem [resolvable:$true] %s1010_s12  ;;  %s1013_s7 = int_to_ptr.hbm [resolvable:$true] %s1012_s7 }
  0x43   : > { %510 = vmatpush.bf16.msra.mxu1 %v1164_v53  ;;  %v1413_v53 = vld [vmem:[#allocation8 + $0xf4] sm:$0xf]  ;;  %s998_s27 = scalar_lea.sflag [#allocation4], %s1953_s6  ;;  %s1727_s28 = sshra.s32 %s1013_s7, 4  ;;  %s1728_s28 = int_to_ptr.hbm [resolvable:$true] %s1727_s28 }
  0x44   : > { %v334_v12 = vmul.f32 %v1538_v9, %v333_v11  ;;  %s1729_s22 = scalar_lea.hbm %s1728_s28, 16  ;;  %s1733_s13 = scalar_lea.hbm %s2099_s5, 32 }
  0x45   : > { %492 = vmatpush.bf16.msra.mxu0 %v1152_v55  ;;  %v1227_v55 = vld [vmem:[#allocation8 + $0x60] sm:$0xf]  ;;  %p1730_p1 = scmp.ne.s32.totalorder %s1728_s28, %s1729_s22  ;;  %p1734_p9 = scmp.lt.s32.totalorder %s1728_s28, %s2099_s5 }
  0x46   : > { %v335_v13 = vadd.f32 %v1538_v9, %v334_v12  ;;  %p1735_p10 = scmp.lt.s32.totalorder %s1733_s13, %s1729_s22 }
  0x47   : > { %511 = vmatpush.bf16.msra.mxu1 %v1156_v58  ;;  %v1396_v58 = vld [vmem:[#allocation8 + $0x64] sm:$0xf0]  ;;  %p1731_p4 = pnand %p1730_p1, %p1923_p5 }
  0x48   : > { %v1973_v14 = vsel %vm336_vm1, %v1538_v9, %v335_v13  ;;  %p1736_p2 = por %p1735_p10, %p1734_p9 }
  0x49   : > { %p1732_p8 = pneg %p1731_p4 }
  0x4b   : > { %p1737_p11 = pnand %p1736_p2, %p1732_p8 }
  0xad   : > { %v327_v15 = vpop.xlane.xlu1 %326  ;;  %v321_v16 = vpop.xlane.xlu0 %320 }
  0xae   : > { %v340_v17 = vmul.f32 %v1973_v14, %v327_v15  ;;  %v338_v18 = vmul.f32 %v1973_v14, %v321_v16 }
  0xb0   : > { %v1977_v19 = vsub.f32 %v314_v0, %v340_v17  ;;  %v1979_v20 = vsub.f32 %v312_v1, %v338_v18  ;;  %v1144_v1 = vor.u32 %v1376_v60, %v1143_v59  ;;  %v2009_v18 = vld [vmem:[#allocation5] sm:$0x1f]  ;;  %v1291_v59 = vld [vmem:[#allocation8 + $0xe0] sm:$0xf] }
  0xb1   : > { %v2024_v35 = vperm.slane %v2009_v18, 1 }
  0xb2   : > { %v348_v21 = vmul.f32 %v1977_v19, %v1977_v19  ;;  %v346_v22 = vmul.f32 %v1979_v20, %v1979_v20  ;;  %493 = vmatpush.bf16.msra.mxu0 %v1144_v1  ;;  %v1411_v1 = vld [vmem:[#allocation8 + $0xe4] sm:$0xf] }
  0xb4   : > { %v356_v23 = vsel %vm318_vm0, %v348_v21, 0.0  ;;  %v350_v24 = vsel %vm318_vm0, %v346_v22, 0.0 }
  0xb5   : > { %v330_v25 = vpop.xlane.xlu1 %329  ;;  %357 = vadd.xlane.f32.xlu0 %v356_v23  ;;  %351 = vadd.xlane.f32.xlu2 %v350_v24  ;;  %v324_v26 = vpop.xlane.xlu0 %323 }
  0xb6   : > { %v341_v27 = vmul.f32 %v1973_v14, %v330_v25  ;;  %v339_v28 = vmul.f32 %v1973_v14, %v324_v26  ;;  %v2014_v26 = vperm.slane %v2009_v18, 0 }
  0xb8   : > { %v1989_v29 = vsub.f32 %v315_v4, %v341_v27  ;;  %v1991_v30 = vsub.f32 %v313_v5, %v339_v28  ;;  %v1148_v4 = vor.u32 %v1375_v61, %v1145_v62  ;;  %v1228_v61 = vor.u32 %v1396_v58, %v1227_v55  ;;  %v1405_v55 = vld [vmem:[#allocation8 + $0xb4] sm:$0xf]  ;;  %v1195_v58 = vld [vmem:[#allocation8 + $0x20] sm:$0xf] }
  0xba   : > { %v349_v31 = vmul.f32 %v1989_v29, %v1989_v29  ;;  %v347_v32 = vmul.f32 %v1991_v30, %v1991_v30  ;;  %512 = vmatpush.bf16.msra.mxu1 %v1148_v4  ;;  %v1293_v4 = vld [vmem:[#allocation8 + $0xe8] sm:$0xf0] }
  0xbc   : > { %v359_v33 = vsel %vm318_vm0, %v349_v31, 0.0  ;;  %v353_v34 = vsel %vm318_vm0, %v347_v32, 0.0 }
  0xbd   : > { %360 = vadd.xlane.f32.xlu1 %v359_v33  ;;  %354 = vadd.xlane.f32.xlu2 %v353_v34  ;;  %v1407_v34 = vld [vmem:[#allocation8 + $0xc4] sm:$0xf] }
 0x128   : > { %v352_v41 = vpop.xlane.xlu2 %351  ;;  %v358_v42 = vpop.xlane.xlu0 %357 }
 0x129   : > { %v362_v43 = vmul.f32 %v352_v41, %v1973_v14  ;;  %v364_v44 = vmul.f32 %v358_v42, %v1973_v14  ;;  %v1235_v41 = vld [vmem:[#allocation8 + $0x70] sm:$0xf]  ;;  %v1398_v42 = vld [vmem:[#allocation8 + $0x74] sm:$0xf0] }
 0x12a   : > { %v1236_v45 = vor.u32 %v1398_v42, %v1235_v41 }
 0x12b   : > { %v366_v52 = vadd.f32 1e-05, %v362_v43  ;;  %v368_v57 = vadd.f32 1e-05, %v364_v44  ;;  %v1299_v43 = vld [vmem:[#allocation8 + $0xf0] sm:$0xf] }
 0x12c   : > { %v1300_v51 = vor.u32 %v1414_v46, %v1299_v43  ;;  %730 = vmatpush.bf16.msra.mxu2 %v1236_v45 }
 0x12d   : > { %1539 = vrsqrt.f32 %v366_v52  ;;  %vm376_vm3 = vweird.f32 %v366_v52  ;;  %vm396_vm5 = vweird.f32 %v368_v57 }
 0x12e   : > { %1541 = vrsqrt.f32 %v368_v57  ;;  %749 = vmatpush.bf16.msra.mxu3 %v1300_v51  ;;  %v1406_v51 = vld [vmem:[#allocation8 + $0xb4] sm:$0xf0] }
 0x130   : > { %v361_v63 = vpop.xlane.xlu1 %360  ;;  %v355_v0 = vpop.xlane.xlu2 %354  ;;  %731 = vmatpush.bf16.msra.mxu2 %v1228_v61  ;;  %v1404_v61 = vld [vmem:[#allocation8 + $0xa4] sm:$0xf0] }
 0x131   : > { %v365_v2 = vmul.f32 %v361_v63, %v1973_v14  ;;  %v363_v3 = vmul.f32 %v355_v0, %v1973_v14  ;;  %v1395_v63 = vld [vmem:[#allocation8 + $0x64] sm:$0xf]  ;;  %v1229_v0 = vld [vmem:[#allocation8 + $0x68] sm:$0xf0] }
 0x133   : > { %v1540_v5 = vpop.eup %1539  ;;  %v369_v6 = vadd.f32 1e-05, %v365_v2  ;;  %v367_v7 = vadd.f32 1e-05, %v363_v3  ;;  %v1232_v3 = vor.u32 %v1395_v63, %v1229_v0  ;;  %v1197_v63 = vld [vmem:[#allocation8 + $0x28] sm:$0xf0] }
 0x134   : > { %v371_v8 = vmul.f32 %v1540_v5, %v366_v52  ;;  %v2003_v10 = vpop.eup %1541  ;;  %vm377_vm2 = vweird.f32 %v1540_v5  ;;  %v1240_v52 = vor.u32 %v1397_v47, %v1237_v48  ;;  %v1390_v48 = vld [vmem:[#allocation8 + $0x34] sm:$0xf0] }
 0x135   : > { %1543 = vrsqrt.f32 %v369_v6  ;;  %v391_v13 = vmul.f32 %v2003_v10, %v368_v57  ;;  %vm378_vm4 = vmor %vm376_vm3, %vm377_vm2  ;;  %vm397_vm6 = vweird.f32 %v2003_v10  ;;  %vm406_vm7 = vweird.f32 %v369_v6 }
 0x136   : > { %v372_v9 = vmul.f32 %v1540_v5, %v371_v8  ;;  %1545 = vrsqrt.f32 %v367_v7  ;;  %vm2019_vm10 = vmor %vm396_vm5, %vm397_vm6  ;;  %vm386_vm12 = vweird.f32 %v367_v7  ;;  %v1304_v57 = vor.u32 %v1413_v53, %v1301_v54  ;;  %768 = vmatpush.bf16.msrb.mxu0 %v1240_v52  ;;  %v1389_v52 = vld [vmem:[#allocation8 + $0x34] sm:$0xf]  ;;  %v1205_v54 = vld [vmem:[#allocation8 + $0x38] sm:$0xf0] }
 0x137   : > { %v392_v23 = vmul.f32 %v2003_v10, %v391_v13  ;;  %v1296_v8 = vor.u32 %v1411_v1, %v1293_v4 }
 0x138   : > { %v373_v11 = vmul.f32 0.5, %v372_v9  ;;  %787 = vmatpush.bf16.msrb.mxu1 %v1304_v57  ;;  %v1283_v9 = vld [vmem:[#allocation8 + $0xd0] sm:$0xf] }
 0x139   : > { %v393_v32 = vmul.f32 0.5, %v392_v23 }
 0x13a   : > { %v374_v12 = vsub.f32 1.5, %v373_v11  ;;  %v1410_v11 = vld [vmem:[#allocation8 + $0xd4] sm:$0xf0]  ;;  %769 = vmatpush.bf16.msrb.mxu0 %v1232_v3  ;;  %v1261_v3 = vld [vmem:[#allocation8 + $0xa8] sm:$0xf0] }
 0x13b   : > { %v2006_v15 = vpop.eup %1543  ;;  %v394_v39 = vsub.f32 1.5, %v393_v32  ;;  %v1391_v32 = vld [vmem:[#allocation8 + $0x44] sm:$0xf] }
 0x13c   : > { %v1546_v14 = vpop.eup %1545  ;;  %v375_v16 = vmul.f32 %v1540_v5, %v374_v12  ;;  %v401_v17 = vmul.f32 %v2006_v15, %v369_v6  ;;  %vm407_vm8 = vweird.f32 %v2006_v15  ;;  %v1394_v6 = vld [vmem:[#allocation8 + $0x54] sm:$0xf0]  ;;  %v1393_v12 = vld [vmem:[#allocation8 + $0x54] sm:$0xf]  ;;  %788 = vmatpush.bf16.msrb.mxu1 %v1296_v8 }
 0x13d   : > { %v381_v21 = vmul.f32 %v1546_v14, %v367_v7  ;;  %vm387_vm9 = vweird.f32 %v1546_v14  ;;  %vm2027_vm11 = vmor %vm406_vm7, %vm407_vm8  ;;  %v395_v60 = vmul.f32 %v2003_v10, %v394_v39 }
 0x13e   : > { %v379_v22 = vsel %vm378_vm4, %v1540_v5, %v375_v16  ;;  %v402_v24 = vmul.f32 %v2006_v15, %v401_v17  ;;  %vm388_vm13 = vmor %vm386_vm12, %vm387_vm9  ;;  %v1219_v5 = vld [vmem:[#allocation8 + $0x50] sm:$0xf]  ;;  %v1409_v16 = vld [vmem:[#allocation8 + $0xd4] sm:$0xf] }
 0x13f   : > { %v382_v25 = vmul.f32 %v1546_v14, %v381_v21  ;;  %v410_v27 = vmul.f32 %v379_v22, %v1979_v20  ;;  %v1220_v13 = vor.u32 %v1394_v6, %v1219_v5  ;;  %v1285_v17 = vld [vmem:[#allocation8 + $0xd8] sm:$0xf0]  ;;  %v399_v21 = vsel %vm2019_vm10, %v2003_v10, %v395_v60  ;;  %v1277_v10 = vld [vmem:[#allocation8 + $0xc8] sm:$0xf0]  ;;  %v1187_v5 = vld [vmem:[#allocation8 + $0x10] sm:$0xf] }
 0x140   : > { %v403_v28 = vmul.f32 0.5, %v402_v24  ;;  %v1284_v22 = vor.u32 %v1410_v11, %v1283_v9  ;;  %v1392_v24 = vld [vmem:[#allocation8 + $0x44] sm:$0xf0]  ;;  %v1280_v42 = vor.u32 %v1407_v34, %v1277_v10  ;;  %v1386_v6 = vld [vmem:[#allocation8 + $0x14] sm:$0xf0] }
 0x141   : > { %v383_v31 = vmul.f32 0.5, %v382_v25  ;;  %v415_v36 = vmul.f32 %v2014_v26, %v410_v27  ;;  %v1288_v27 = vor.u32 %v1409_v16, %v1285_v17  ;;  %732 = vmatpush.bf16.msra.mxu2 %v1220_v13  ;;  %v1188_v8 = vor.u32 %v1386_v6, %v1187_v5  ;;  %v1402_v9 = vld [vmem:[#allocation8 + $0x94] sm:$0xf0]  ;;  %v1385_v11 = vld [vmem:[#allocation8 + $0x14] sm:$0xf]  ;;  %v1419_v5 = vld [vmem:[#allocation10 + $0x20] sm:$0xff] }
 0x142   : > { %v404_v20 = vsub.f32 1.5, %v403_v28  ;;  %v1275_v28 = vld [vmem:[#allocation8 + $0xc0] sm:$0xf]  ;;  %v1401_v16 = vld [vmem:[#allocation8 + $0x94] sm:$0xf] }
 0x143   : > { %v384_v33 = vsub.f32 1.5, %v383_v31  ;;  %v420_v50 = vadd.f32 %v2024_v35, %v415_v36  ;;  %v1408_v31 = vld [vmem:[#allocation8 + $0xc4] sm:$0xf0]  ;;  %v412_v36 = vmul.f32 %v399_v21, %v1977_v19  ;;  %789 = vmatpush.bf16.msrb.mxu1 %v1288_v27  ;;  %v1253_v17 = vld [vmem:[#allocation8 + $0x98] sm:$0xf0]  ;;  %v1425_v6 = vld [vmem:[#allocation10 + $0x50] sm:$0xff] }
 0x144   : > { %v405_v49 = vmul.f32 %v2006_v15, %v404_v20  ;;  %v1256_v21 = vor.u32 %v1401_v16, %v1253_v17  ;;  %v1383_v27 = vld [vmem:[#allocation8 + $0x4] sm:$0xf]  ;;  %v2053_v10 = vld [vmem:[#allocation5 + $0x8] sm:$0x1f] }
 0x145   : > { %v385_v38 = vmul.f32 %v1546_v14, %v384_v33  ;;  %1547 = vtanh.f32 %v420_v50  ;;  %v1213_v33 = vld [vmem:[#allocation8 + $0x48] sm:$0xf0]  ;;  %v417_v43 = vmul.f32 %v2014_v26, %v412_v36  ;;  %v569_v17 = vperm.slane %v2053_v10, 3 }
 0x146   : > { %v409_v7 = vsel %vm2027_vm11, %v2006_v15, %v405_v49  ;;  %v1211_v15 = vld [vmem:[#allocation8 + $0x40] sm:$0xf]  ;;  %v1267_v49 = vld [vmem:[#allocation8 + $0xb0] sm:$0xf]  ;;  %v1245_v36 = vld [vmem:[#allocation8 + $0x88] sm:$0xf0] }
 0x147   : > { %v389_v40 = vsel %vm388_vm13, %v1546_v14, %v385_v38  ;;  %v1221_v14 = vld [vmem:[#allocation8 + $0x58] sm:$0xf0]  ;;  %v413_v25 = vmul.f32 %v409_v7, %v1989_v29  ;;  %v1212_v20 = vor.u32 %v1392_v24, %v1211_v15  ;;  %v1276_v29 = vor.u32 %v1408_v31, %v1275_v28  ;;  %790 = vmatpush.bf16.msrb.mxu1 %v1280_v42  ;;  %v1251_v7 = vld [vmem:[#allocation8 + $0x90] sm:$0xf]  ;;  %v1243_v15 = vld [vmem:[#allocation8 + $0x80] sm:$0xf] }
 0x148   : > { %v411_v44 = vmul.f32 %v389_v40, %v1991_v30  ;;  %v1412_v30 = vld [vmem:[#allocation8 + $0xe4] sm:$0xf0]  ;;  %v1224_v23 = vor.u32 %v1393_v12, %v1221_v14  ;;  %v1216_v40 = vor.u32 %v1391_v32, %v1213_v33  ;;  %v1268_v53 = vor.u32 %v1406_v51, %v1267_v49  ;;  %v1189_v12 = vld [vmem:[#allocation8 + $0x18] sm:$0xf0]  ;;  %v1181_v28 = vld [vmem:[#allocation8 + $0x8] sm:$0xf0] }
 0x149   : > { %v1292_v62 = vor.u32 %v1412_v30, %v1291_v59  ;;  %v418_v39 = vmul.f32 %v2014_v26, %v413_v25  ;;  %733 = vmatpush.bf16.msra.mxu2 %v1212_v20  ;;  %v1388_v59 = vld [vmem:[#allocation8 + $0x24] sm:$0xf0]  ;;  %v1259_v30 = vld [vmem:[#allocation8 + $0xa0] sm:$0xf]  ;;  %v1252_v13 = vor.u32 %v1402_v9, %v1251_v7  ;;  %v1192_v14 = vor.u32 %v1385_v11, %v1189_v12  ;;  %v1399_v33 = vld [vmem:[#allocation8 + $0x84] sm:$0xf] }
 0x14a   : > { %v416_v56 = vmul.f32 %v2014_v26, %v411_v44  ;;  %770 = vmatpush.bf16.msrb.mxu0 %v1224_v23  ;;  %v422_v44 = vadd.f32 %v2024_v35, %v417_v43  ;;  %v1203_v26 = vld [vmem:[#allocation8 + $0x30] sm:$0xf]  ;;  %v1196_v60 = vor.u32 %v1388_v59, %v1195_v58  ;;  %v1260_v0 = vor.u32 %v1404_v61, %v1259_v30  ;;  %v1384_v23 = vld [vmem:[#allocation8 + $0x4] sm:$0xf0]  ;;  %v1427_v49 = vld [vmem:[#allocation10 + $0x60] sm:$0xff] }
 0x14b   : > { %750 = vmatpush.bf16.msra.mxu3 %v1292_v62  ;;  %v1548_v37 = vpop.eup %1547  ;;  %v423_v19 = vadd.f32 %v2024_v35, %v418_v39  ;;  %v1204_v50 = vor.u32 %v1390_v48, %v1203_v26  ;;  %v1387_v62 = vld [vmem:[#allocation8 + $0x24] sm:$0xf]  ;;  %v1400_v25 = vld [vmem:[#allocation8 + $0x84] sm:$0xf0]  ;;  %v1184_v32 = vor.u32 %v1383_v27, %v1181_v28  ;;  %v1248_v20 = vor.u32 %v1399_v33, %v1245_v36  ;;  %v1422_v39 = vld [vmem:[#allocation10 + $0x38] sm:$0xff] }
 0x14c   : > { %v421_v2 = vadd.f32 %v2024_v35, %v416_v56  ;;  %v1208_v35 = vor.u32 %v1389_v52, %v1205_v54  ;;  %v1269_v56 = vld [vmem:[#allocation8 + $0xb8] sm:$0xf0]  ;;  %v1200_v1 = vor.u32 %v1387_v62, %v1197_v63  ;;  %v1244_v31 = vor.u32 %v1400_v25, %v1243_v15  ;;  %v1428_v43 = vld [vmem:[#allocation10 + $0x68] sm:$0xff]  ;;  %v1417_v9 = vld [vmem:[#allocation10 + $0x10] sm:$0xff] }
 0x14d   : > { %734 = vmatpush.bf16.msra.mxu2 %v1204_v50  ;;  %v1272_v57 = vor.u32 %v1405_v55, %v1269_v56  ;;  %v439_v42 = vperm.slane %v2053_v10, 2  ;;  %v1418_v7 = vld [vmem:[#allocation10 + $0x18] sm:$0xff]  ;;  %v1423_v11 = vld [vmem:[#allocation10 + $0x40] sm:$0xff]  ;;  %v1416_v12 = vld [vmem:[#allocation10 + $0x8] sm:$0xff]  ;;  %v568_v15 = vperm.slane %v2009_v18, 3 }
 0x14e   : > { %1549 = vtanh.f32 %v421_v2  ;;  %771 = vmatpush.bf16.msrb.mxu0 %v1216_v40  ;;  %v1403_v2 = vld [vmem:[#allocation8 + $0xa4] sm:$0xf]  ;;  %v1421_v40 = vld [vmem:[#allocation10 + $0x30] sm:$0xff] }
 0x14f   : > { %751 = vmatpush.bf16.msra.mxu3 %v1284_v22  ;;  %1551 = vtanh.f32 %v423_v19  ;;  %791 = vmatpush.bf16.msrb.mxu1 %v1272_v57  ;;  %v1264_v4 = vor.u32 %v1403_v2, %v1261_v3  ;;  %v1179_v22 = vld [vmem:[#allocation8] sm:$0xf]  ;;  %v1420_v19 = vld [vmem:[#allocation10 + $0x28] sm:$0xff] }
 0x150   : > { %1553 = vtanh.f32 %v422_v44  ;;  %v1180_v24 = vor.u32 %v1384_v23, %v1179_v22 }
 0x151   : > { %735 = vmatpush.bf16.msra.mxu2 %v1196_v60 }
 0x152   : > { %772 = vmatpush.bf16.msrb.mxu0 %v1208_v35 }
 0x153   : > { %752 = vmatpush.bf16.msra.mxu3 %v1276_v29  ;;  %792 = vmatpush.bf16.msrb.mxu1 %v1264_v4  ;;  %v1429_v29 = vld [vmem:[#allocation10 + $0x70] sm:$0xff]  ;;  %v1426_v4 = vld [vmem:[#allocation10 + $0x58] sm:$0xff] }
 0x154   : > { %v1550_v38 = vpop.eup %1549 }
 0x155   : > { %v428_v41 = vpack.c.bf16 %v1550_v38, %v1548_v37  ;;  %v1552_v45 = vpop.eup %1551  ;;  %736 = vmatpush.bf16.msra.mxu2 %v1188_v8  ;;  %v1430_v38 = vld [vmem:[#allocation10 + $0x78] sm:$0xff]  ;;  %v1424_v8 = vld [vmem:[#allocation10 + $0x48] sm:$0xff] }
 0x156   : > { %v1554_v46 = vpop.eup %1553  ;;  %773 = vmatpush.bf16.msrb.mxu0 %v1200_v1 }
 0x157   : > { %1173 = vmatmul.msk.bf16.vlgmr.msra.gmra.mxu0 %vm318_vm0, %v428_v41  ;;  %1175 = vmatmul.msk.bf16.vlgmr.msra.gmra.mxu1 %vm318_vm0, %v428_v41  ;;  %v429_v47 = vpack.c.bf16 %v1552_v45, %v1554_v46  ;;  %v438_v41 = vperm.slane %v2009_v18, 2 }
 0x158   : > { %753 = vmatpush.bf16.msra.mxu3 %v1268_v53  ;;  %793 = vmatpush.bf16.msrb.mxu1 %v1256_v21 }
 0x159   : > { %737 = vmatpush.bf16.msra.mxu2 %v1180_v24 }
 0x15a   : > { %774 = vmatpush.bf16.msrb.mxu0 %v1192_v14 }
 0x15c   : > { %754 = vmatpush.bf16.msra.mxu3 %v1260_v0  ;;  %794 = vmatpush.bf16.msrb.mxu1 %v1248_v20 }
 0x15d   : > { %947 = vmatpush.bf16.msrb.mxu2 %v1422_v39 }
 0x15e   : > { %775 = vmatpush.bf16.msrb.mxu0 %v1184_v32 }
 0x160   : > { %755 = vmatpush.bf16.msra.mxu3 %v1252_v13  ;;  %v1415_v13 = vld [vmem:[#allocation10] sm:$0xff] }
 0x161   : > { %948 = vmatpush.bf16.msrb.mxu2 %v1421_v40 }
 0x164   : > { %756 = vmatpush.bf16.msra.mxu3 %v1244_v31 }
 0x165   : > { %949 = vmatpush.bf16.msrb.mxu2 %v1420_v19 }
 0x167   : > { %1174 = vmatmul.msk.bf16.gmra.mxu0 %vm318_vm0, %v429_v47  ;;  %1176 = vmatmul.msk.bf16.gmra.mxu1 %vm318_vm0, %v429_v47 }
 0x168   : > { %966 = vmatpush.bf16.msrb.mxu3 %v1430_v38 }
 0x169   : > { %950 = vmatpush.bf16.msrb.mxu2 %v1419_v5 }
 0x16c   : > { %967 = vmatpush.bf16.msrb.mxu3 %v1429_v29 }
 0x16d   : > { %951 = vmatpush.bf16.msrb.mxu2 %v1418_v7 }
 0x170   : > { %968 = vmatpush.bf16.msrb.mxu3 %v1428_v43 }
 0x171   : > { %952 = vmatpush.bf16.msrb.mxu2 %v1417_v9 }
 0x174   : > { %969 = vmatpush.bf16.msrb.mxu3 %v1427_v49 }
 0x175   : > { %953 = vmatpush.bf16.msrb.mxu2 %v1416_v12 }
 0x178   : > { %970 = vmatpush.bf16.msrb.mxu3 %v1426_v4 }
 0x179   : > { %954 = vmatpush.bf16.msrb.mxu2 %v1415_v13 }
 0x17c   : > { %971 = vmatpush.bf16.msrb.mxu3 %v1425_v6 }
 0x180   : > { %972 = vmatpush.bf16.msrb.mxu3 %v1424_v8 }
 0x184   : > { %973 = vmatpush.bf16.msrb.mxu3 %v1423_v11 }
 0x1d4   : > { %v495_v34 = vpop.f32.mrf.mxu0  ;;  %v514_v37 = vpop.f32.mrf.mxu1 }
 0x1d5   : > { %v496_v44 = vadd.f32 %v495_v34, %v438_v41  ;;  %v515_v45 = vadd.f32 %v514_v37, %v439_v42 }
 0x1d7   : > { %v524_v50 = vmax.f32 %v496_v44, 0.0  ;;  %v525_v51 = vmax.f32 %v515_v45, 0.0 }
 0x1dc   : > { %v497_v46 = vpop.f32.mrf.mxu0  ;;  %v516_v47 = vpop.f32.mrf.mxu1 }
 0x1dd   : > { %v498_v26 = vadd.f32 %v497_v46, %v438_v41  ;;  %v517_v48 = vadd.f32 %v516_v47, %v439_v42 }
 0x1df   : > { %v526_v52 = vmax.f32 %v498_v26, 0.0  ;;  %v527_v53 = vmax.f32 %v517_v48, 0.0 }
 0x1e1   : > { %v532_v54 = vpack.c.bf16 %v526_v52, %v524_v50  ;;  %v533_v55 = vpack.c.bf16 %v527_v53, %v525_v51 }
 0x1e3   : > { %738 = vmatmul.bf16.vlgmr.msra.gmra.mxu2 %v532_v54  ;;  %757 = vmatmul.bf16.vlgmr.msra.gmra.mxu3 %v533_v55 }
 0x1e4   : > { %776 = vmatmul.bf16.vlgmr.msrb.gmra.mxu0 %v532_v54  ;;  %795 = vmatmul.bf16.vlgmr.msrb.gmra.mxu1 %v533_v55  ;;  %v500_v35 = vpop.f32.mrf.mxu0  ;;  %v519_v56 = vpop.f32.mrf.mxu1 }
 0x1e5   : > { %v501_v57 = vadd.f32 %v500_v35, %v438_v41  ;;  %v520_v58 = vadd.f32 %v519_v56, %v439_v42 }
 0x1e7   : > { %v528_v62 = vmax.f32 %v501_v57, 0.0  ;;  %v529_v63 = vmax.f32 %v520_v58, 0.0 }
 0x1ec   : > { %v502_v59 = vpop.f32.mrf.mxu0  ;;  %v521_v30 = vpop.f32.mrf.mxu1 }
 0x1ed   : > { %v503_v60 = vadd.f32 %v502_v59, %v438_v41  ;;  %v522_v61 = vadd.f32 %v521_v30, %v439_v42 }
 0x1ef   : > { %v530_v0 = vmax.f32 %v503_v60, 0.0  ;;  %v531_v1 = vmax.f32 %v522_v61, 0.0  ;;  %v850_v61 = vperm.slane %v2009_v18, 4 }
 0x1f1   : > { %v534_v2 = vpack.c.bf16 %v530_v0, %v528_v62  ;;  %v535_v3 = vpack.c.bf16 %v531_v1, %v529_v63 }
 0x1f3   : > { %743 = vmatmul.bf16.gmra.mxu2 %v534_v2  ;;  %762 = vmatmul.bf16.gmra.mxu3 %v535_v3 }
 0x1f4   : > { %781 = vmatmul.bf16.gmra.mxu0 %v534_v2  ;;  %800 = vmatmul.bf16.gmra.mxu1 %v535_v3 }
 0x261   : > { %v777_v14 = vpop.f32.mrf.mxu0  ;;  %v796_v16 = vpop.f32.mrf.mxu1 }
 0x262   : > { %v778_v21 = vadd.f32 %v777_v14, %v569_v17 }
 0x264   : > { %v797_v27 = vadd.f32 %v796_v16, %v778_v21 }
 0x266   : > { %v739_v22 = vpop.f32.mrf.mxu2  ;;  %v758_v23 = vpop.f32.mrf.mxu3  ;;  %v807_v33 = vmax.f32 %v797_v27, 0.0 }
 0x267   : > { %v740_v31 = vadd.f32 %v739_v22, %v568_v15 }
 0x269   : > { %v779_v24 = vpop.f32.mrf.mxu0  ;;  %v798_v25 = vpop.f32.mrf.mxu1  ;;  %v759_v37 = vadd.f32 %v758_v23, %v740_v31 }
 0x26a   : > { %v780_v28 = vadd.f32 %v779_v24, %v569_v17 }
 0x26b   : > { %v806_v41 = vmax.f32 %v759_v37, 0.0 }
 0x26c   : > { %v799_v32 = vadd.f32 %v798_v25, %v780_v28 }
 0x26e   : > { %v809_v36 = vmax.f32 %v799_v32, 0.0  ;;  %v741_v20 = vpop.f32.mrf.mxu2  ;;  %v760_v34 = vpop.f32.mrf.mxu3 }
 0x26f   : > { %v742_v38 = vadd.f32 %v741_v20, %v568_v15 }
 0x270   : > { %v815_v39 = vpack.c.bf16 %v809_v36, %v807_v33 }
 0x271   : > { %v761_v29 = vadd.f32 %v760_v34, %v742_v38  ;;  %v782_v10 = vpop.f32.mrf.mxu0  ;;  %v801_v40 = vpop.f32.mrf.mxu1 }
 0x272   : > { %974 = vmatmul.bf16.vlgmr.msrb.gmra.mxu3 %v815_v39  ;;  %v783_v19 = vadd.f32 %v782_v10, %v569_v17 }
 0x273   : > { %v808_v42 = vmax.f32 %v761_v29, 0.0 }
 0x274   : > { %v802_v47 = vadd.f32 %v801_v40, %v783_v19 }
 0x275   : > { %v814_v43 = vpack.c.bf16 %v808_v42, %v806_v41 }
 0x276   : > { %v744_v44 = vpop.f32.mrf.mxu2  ;;  %v763_v45 = vpop.f32.mrf.mxu3  ;;  %v811_v51 = vmax.f32 %v802_v47, 0.0 }
 0x277   : > { %955 = vmatmul.bf16.vlgmr.msrb.gmra.mxu2 %v814_v43  ;;  %v745_v48 = vadd.f32 %v744_v44, %v568_v15 }
 0x279   : > { %v784_v46 = vpop.f32.mrf.mxu0  ;;  %v803_v49 = vpop.f32.mrf.mxu1  ;;  %v764_v54 = vadd.f32 %v763_v45, %v745_v48 }
 0x27a   : > { %v785_v26 = vadd.f32 %v784_v46, %v569_v17 }
 0x27b   : > { %v810_v58 = vmax.f32 %v764_v54, 0.0 }
 0x27c   : > { %v804_v50 = vadd.f32 %v803_v49, %v785_v26 }
 0x27e   : > { %v813_v52 = vmax.f32 %v804_v50, 0.0  ;;  %v746_v53 = vpop.f32.mrf.mxu2  ;;  %v765_v35 = vpop.f32.mrf.mxu3 }
 0x27f   : > { %v747_v55 = vadd.f32 %v746_v53, %v568_v15 }
 0x280   : > { %v817_v56 = vpack.c.bf16 %v813_v52, %v811_v51 }
 0x281   : > { %v766_v57 = vadd.f32 %v765_v35, %v747_v55 }
 0x282   : > { %979 = vmatmul.bf16.gmra.mxu3 %v817_v56 }
 0x283   : > { %v812_v59 = vmax.f32 %v766_v57, 0.0 }
 0x285   : > { %v816_v30 = vpack.c.bf16 %v812_v59, %v810_v58 }
 0x287   : > { %960 = vmatmul.bf16.gmra.mxu2 %v816_v30 }
 0x2f5   : > { %v975_v60 = vpop.f32.mrf.mxu3 }
 0x2fa   : > { %v956_v62 = vpop.f32.mrf.mxu2 }
 0x2fb   : > { %v957_v63 = vadd.f32 %v956_v62, %v850_v61 }
 0x2fd   : > { %v977_v0 = vpop.f32.mrf.mxu3  ;;  %v976_v1 = vadd.f32 %v975_v60, %v957_v63 }
 0x2ff   : > { %1555 = vtanh.f32 %v976_v1 }
 0x302   : > { %v958_v2 = vpop.f32.mrf.mxu2 }
 0x303   : > { %v959_v3 = vadd.f32 %v958_v2, %v850_v61 }
 0x305   : > { %v978_v4 = vadd.f32 %v977_v0, %v959_v3  ;;  %v980_v5 = vpop.f32.mrf.mxu3  ;;  %v1556_v7 = vpop.eup %1555 }
 0x307   : > { %1557 = vtanh.f32 %v978_v4 }
 0x30a   : > { %v961_v6 = vpop.f32.mrf.mxu2 }
 0x30b   : > { %v962_v11 = vadd.f32 %v961_v6, %v850_v61 }
 0x30d   : > { %v1558_v8 = vpop.eup %1557  ;;  %v981_v18 = vadd.f32 %v980_v5, %v962_v11  ;;  %v982_v14 = vpop.f32.mrf.mxu3 }
 0x30e   : > { %v1435_v9 = vpack.c.bf16 %v1558_v8, %v1556_v7 }
 0x30f   : > { %1559 = vtanh.f32 %v981_v18 }
 0x310   : > { %1436 = vst [vmem:[%s308_s29] sm:$0xff] %v1435_v9  }
 0x312   : > { %v963_v12 = vpop.f32.mrf.mxu2 }
 0x313   : > { %v964_v13 = vadd.f32 %v963_v12, %v850_v61 }
 0x315   : > { %v983_v16 = vadd.f32 %v982_v14, %v964_v13  ;;  %v1560_v17 = vpop.eup %1559 }
 0x317   : > { %1561 = vtanh.f32 %v983_v16 }
 0x31d   : > { %v1562_v21 = vpop.eup %1561 }
 0x31e   : > { %v1440_v22 = vpack.c.bf16 %v1562_v21, %v1560_v17 }
 0x320   : > { %1442 = vst [vmem:[%s308_s29 + $0x8] sm:$0xff] %v1440_v22  }
 0x321   : > { %1740 = shalt.err (!%p1737_p11)
}
 0x322   : > { %s1798_s6 = smov 64   ;;  %s1799_s24 = smov 4  }
 0x323   : > { %1461 = dma.vmem_to_hbm [thread:$0]  (%p1923_p5), %s1011_s12, 256, %s1013_s7, %s998_s27, %s1798_s6, %s1798_s6, %s1799_s24  }
 0x324 PF: > { %s1027_s29 = sand.u32 1, %s1775_s18   ;;  %p2112_p12 = scmp.ge.s32.totalorder %s1787_s21, 2 }
 0x325   : > { %s1028_s17 = scalar_lea.sflag [#allocation4], %s1027_s29 }
 0x326   : > { %p1481_p13 = pnand %p2112_p12, %p1865_p6 }
 0x328   : > { %p1482_p0 = pneg %p1481_p13 }
 0x32a   : > { %1770 = dma.done.wait (%p1482_p0), %s1028_s17, 256  }
 0x32b   : > { %1772 = vsyncadd (%p1482_p0), %s1028_s17, 4294967040  ;;  %p20_p3 = scmp.ge.s32.totalorder %s1910_s11, 4   ;;  %s2113_s18 = smov %s1779_s19 }
 0x32c   : > { %s2114_s19 = smov %s1783_s20  ;;  %s2115_s20 = smov %s1919_s14 }
 0x32d   : > { %s2116_s21 = smov %s1910_s11  ;;  %22 = sbr.rel (!%p20_p3) target bundleno = 7 (0x7), region = 101 }
 0x332   :  { %1034 = vsyncpa [#allocation3], 1 }
 0x333   :  { %1036 = vsyncpa [#allocation3 + $0x1], 1 }
 0x334   :  { %1037 = vsyncpa [#allocation6], 1 }
 0x335   :  { %1038 = vsyncpa [#allocation9], 1 }
 0x336   :  { %1039 = vsyncpa [#allocation4], 1 }
 0x337   :  { %1041 = vsyncpa [#allocation4 + $0x1], 1 }

</bundles_post_ra>
